<compile_context>
chip_gen: v6e
topology: v6e:2x2x1
jax: 0.10.0
libtpu: 0.0.40
codegen_flags: <defaults>
</compile_context>

<pallas_src>
import jax
import jax.numpy as jnp
from jax.experimental import pallas as pl
from jax.experimental.pallas import tpu as pltpu

LANE = 128


def gcn_kernel(x_ref, aw1_ref, b1_ref, aw2_ref, b2_ref, w3_ref, b3_ref,
               out_ref):
    """One packed-row tile of the GCN forward.

    x_ref:   (TILE_P, K)   packed input rows (f32, cast to MXU dtype in-kernel)
    aw1_ref: (K, K)        block-diag(adjacency @ W1)
    aw2_ref: (K, K)        block-diag(adjacency @ W2)
    w3_ref:  (K, N)        block-diag(W3)
    b*_ref:  (1, ...)      f32 biases (tiled across the packed groups)
    out_ref: (TILE_P, N)   f32 packed output (N = PACK * 8, no padded lanes)
    """
    # In-kernel dtype cast (free VPU op in a memory-bound regime; no-op for f32).
    x = x_ref[...].astype(aw1_ref.dtype)

    # h1 = relu(x @ (A @ W1) + b1)  -- f32 accumulation / bias / ReLU
    h = jnp.dot(x, aw1_ref[...], preferred_element_type=jnp.float32)
    h = jnp.maximum(h + b1_ref[...], 0.0)

    # h2 = relu(h1 @ (A @ W2) + b2)
    h = jnp.dot(h.astype(aw2_ref.dtype), aw2_ref[...],
                preferred_element_type=jnp.float32)
    h = jnp.maximum(h + b2_ref[...], 0.0)

    # out = h2 @ W3 + b3  (packed: each 8-wide output group sits in its own lanes)
    out = jnp.dot(h.astype(w3_ref.dtype), w3_ref[...],
                  preferred_element_type=jnp.float32)
    out_ref[...] = out + b3_ref[...]


def _block_diag(w, n):
    """Block-diagonal replication of w, n times (built once; tiny)."""
    k, m = w.shape
    out = jnp.zeros((n * k, n * m), w.dtype)
    for i in range(n):
        out = out.at[i * k:(i + 1) * k, i * m:(i + 1) * m].set(w)
    return out


def gcn_forward(x, adjacency, params, *, tile_rows=4096, use_bf16=True):
    """x: (B, M, F) f32; adjacency: (F, F) f32; params: (in, out)-layout linears.

    Weights are stored as (in_features, out_features), so the math is
    h @ W + b (equivalent to torch's h @ W_torch.T + b).
    """
    B, M, F = x.shape
    H = params["w1"].shape[1]
    O = params["w3"].shape[1]
    assert adjacency.shape == (F, F), "adjacency must be (input_size, input_size)"
    assert H == F, "adjacency fold into layer 2 requires num_hidden == input_size"

    # --- Fold the adjacency into the first two layers: (X@A)@W == X@(A@W).
    aw1 = jnp.dot(adjacency, params["w1"])          # (F, H)
    aw2 = jnp.dot(adjacency, params["w2"])          # (H, H)

    # --- Lane packing: PACK real rows per 128-lane row, block-diagonal weights.
    PACK = max(1, LANE // F)                        # 4 for F=32
    K = PACK * F                                    # 128
    N = PACK * O                                    # 32

    compute_dtype = jnp.bfloat16 if use_bf16 else jnp.float32
    aw1_bd = _block_diag(aw1, PACK).astype(compute_dtype)          # (K, K)
    aw2_bd = _block_diag(aw2, PACK).astype(compute_dtype)          # (K, K)
    w3_bd = _block_diag(params["w3"], PACK).astype(compute_dtype)  # (K, N)
    b1_bd = jnp.tile(params["b1"], (1, PACK))                      # (1, K) f32
    b2_bd = jnp.tile(params["b2"], (1, PACK))                      # (1, K) f32
    b3_bd = jnp.tile(params["b3"], (1, PACK))                      # (1, N) f32

    # --- Packed-row tiling.
    R = B * M
    rp_logical = -(-R // PACK)                      # packed rows needed
    tile_p = max(1, tile_rows // PACK)              # desired packed-row tile
    if rp_logical <= tile_p:
        if rp_logical >= 32:
            # enough work: split ~4 ways so v7x's two TCs both get grid steps
            tile_p = max(8, ((rp_logical // 4) // 8) * 8)
        else:
            tile_p = rp_logical                     # single block, no padding
    rp = -(-rp_logical // tile_p) * tile_p
    r_pad = rp * PACK

    x2d = x.reshape(R, F)
    if r_pad != R:
        # Ragged tail only: dormant when the tile divides R (as in the demo).
        x2d = jnp.pad(x2d, ((0, r_pad - R), (0, 0)))
    xp = x2d.reshape(rp, K)                         # contiguous pack: free reshape

    const = lambda i: (0, 0)                        # weights/biases stay VMEM-resident
    itemsize = jnp.dtype(x.dtype).itemsize
    cost = pl.CostEstimate(
        flops=2 * r_pad * (F * H + H * H + H * O),
        transcendentals=0,
        bytes_accessed=r_pad * F * itemsize + r_pad * O * 4,
    )

    outp = pl.pallas_call(
        gcn_kernel,
        out_shape=jax.ShapeDtypeStruct((rp, N), jnp.float32),
        grid=(rp // tile_p,),
        in_specs=[
            pl.BlockSpec((tile_p, K), lambda i: (i, 0)),   # packed x tile (streamed)
            pl.BlockSpec((K, K), const),                   # diag(AW1)
            pl.BlockSpec((1, K), const),                   # b1 (tiled)
            pl.BlockSpec((K, K), const),                   # diag(AW2)
            pl.BlockSpec((1, K), const),                   # b2 (tiled)
            pl.BlockSpec((K, N), const),                   # diag(W3)
            pl.BlockSpec((1, N), const),                   # b3 (tiled)
        ],
        out_specs=pl.BlockSpec((tile_p, N), lambda i: (i, 0)),
        compiler_params=pltpu.CompilerParams(
            dimension_semantics=("parallel",)),            # megacore on v7x
        cost_estimate=cost,
    )(xp, aw1_bd, b1_bd, aw2_bd, b2_bd, w3_bd, b3_bd)

    # Unpack: (rp, PACK*O) -> (r_pad, O) is the exact row-major inverse of the pack.
    out2d = outp.reshape(r_pad, O)[:R]
    return out2d.reshape(B, M, O)


def gcn_reference(x, adjacency, params):
    """Pure-JAX reference mirroring the PyTorch forward exactly."""
    h = jnp.matmul(x, adjacency)
    h = jnp.maximum(jnp.matmul(h, params["w1"]) + params["b1"], 0.0)
    h = jnp.matmul(h, adjacency)
    h = jnp.maximum(jnp.matmul(h, params["w2"]) + params["b2"], 0.0)
    return jnp.matmul(h, params["w3"]) + params["b3"]


def init_params(key, input_size, num_hidden, out_size=8):
    """Deterministic uniform init mimicking nn.Linear's U(-1/sqrt(in), 1/sqrt(in))."""
    ks = jax.random.split(key, 6)

    def lin(kw, kb, fan_in, fan_out):
        bound = 1.0 / jnp.sqrt(fan_in)
        w = jax.random.uniform(kw, (fan_in, fan_out), jnp.float32, -bound, bound)
        b = jax.random.uniform(kb, (1, fan_out), jnp.float32, -bound, bound)
        return w, b

    w1, b1 = lin(ks[0], ks[1], input_size, num_hidden)
    w2, b2 = lin(ks[2], ks[3], num_hidden, num_hidden)
    w3, b3 = lin(ks[4], ks[5], num_hidden, out_size)
    return {"w1": w1, "b1": b1, "w2": w2, "b2": b2, "w3": w3, "b3": b3}


def _check(out, ref, *, f32):
    assert out.shape == ref.shape, (out.shape, ref.shape)
    if f32:
        assert jnp.allclose(out, ref, atol=1e-3, rtol=1e-3), "f32 mismatch vs reference"
    else:
        # Relative max-error check (tighter than a flat atol=0.5 bound).
        scale = jnp.max(jnp.abs(ref)) + 1e-6
        rel = jnp.max(jnp.abs(out - ref)) / scale
        assert rel < 0.05, f"bf16 relative error too large: {rel}"


if __name__ == "__main__":
    # Small shapes: batch=2, nodes=8, input_size = num_hidden_units = 32
    # (the PyTorch module requires input_size == num_hidden == adjacency dim).
    INPUT_SIZE = 32
    NUM_HIDDEN = 32

    key = jax.random.PRNGKey(0)
    k_x, k_adj, k_p, k_x2 = jax.random.split(key, 4)

    adjacency = jax.random.uniform(k_adj, (INPUT_SIZE, INPUT_SIZE),
                                   dtype=jnp.float32)
    params = init_params(k_p, INPUT_SIZE, NUM_HIDDEN)

    # --- Primary demo shape: batch=2, nodes=8 (single grid step).
    B, M = 2, 8
    x = jax.random.normal(k_x, (B, M, INPUT_SIZE), dtype=jnp.float32)
    ref = gcn_reference(x, adjacency, params)

    out_f32 = jax.block_until_ready(gcn_forward(x, adjacency, params, use_bf16=False))
    _check(out_f32, ref, f32=True)

    out_bf16 = jax.block_until_ready(gcn_forward(x, adjacency, params, use_bf16=True))
    _check(out_bf16, ref, f32=False)

    # --- Secondary shape exercising the multi-step parallel grid path.
    B2, M2 = 4, 64
    x2 = jax.random.normal(k_x2, (B2, M2, INPUT_SIZE), dtype=jnp.float32)
    ref2 = gcn_reference(x2, adjacency, params)
    out2 = jax.block_until_ready(gcn_forward(x2, adjacency, params, use_bf16=True))
    _check(out2, ref2, f32=False)

    print("KERNEL_OK")
</pallas_src>

<mosaic_0001>
module attributes {stable_mosaic.version = 11 : i64} {
  func.func @gcn_kernel(%arg0: i32, %arg1: memref<4x128xf32, #tpu.memory_space<vmem>>, %arg2: memref<128x128xf32, #tpu.memory_space<vmem>>, %arg3: memref<1x128xf32, #tpu.memory_space<vmem>>, %arg4: memref<128x128xf32, #tpu.memory_space<vmem>>, %arg5: memref<1x128xf32, #tpu.memory_space<vmem>>, %arg6: memref<128x32xf32, #tpu.memory_space<vmem>>, %arg7: memref<1x32xf32, #tpu.memory_space<vmem>>, %arg8: memref<4x32xf32, #tpu.memory_space<vmem>>) attributes {dimension_semantics = [#tpu.dimension_semantics<parallel>], iteration_bounds = array<i64: 1>, scalar_prefetch = 0 : i64, scratch_operands = 0 : i64, tpu.core_type = #tpu.core_type<tc>, window_params = [{transform_indices = @transform_0, window_bounds = array<i64: 4, 128>}, {pipeline_mode = #tpu.pipeline_mode<synchronous>, transform_indices = @transform_1, window_bounds = array<i64: 128, 128>}, {pipeline_mode = #tpu.pipeline_mode<synchronous>, transform_indices = @transform_2, window_bounds = array<i64: 1, 128>}, {pipeline_mode = #tpu.pipeline_mode<synchronous>, transform_indices = @transform_3, window_bounds = array<i64: 128, 128>}, {pipeline_mode = #tpu.pipeline_mode<synchronous>, transform_indices = @transform_4, window_bounds = array<i64: 1, 128>}, {pipeline_mode = #tpu.pipeline_mode<synchronous>, transform_indices = @transform_5, window_bounds = array<i64: 128, 32>}, {pipeline_mode = #tpu.pipeline_mode<synchronous>, transform_indices = @transform_6, window_bounds = array<i64: 1, 32>}, {transform_indices = @transform_7, window_bounds = array<i64: 4, 32>}]} {
    %c0 = arith.constant 0 : index
    %c0_0 = arith.constant 0 : index
    %0 = vector.load %arg1[%c0, %c0_0] : memref<4x128xf32, #tpu.memory_space<vmem>>, vector<4x128xf32>
    %c0_1 = arith.constant 0 : index
    %c0_2 = arith.constant 0 : index
    %1 = vector.load %arg2[%c0_1, %c0_2] : memref<128x128xf32, #tpu.memory_space<vmem>>, vector<128x128xf32>
    %cst = arith.constant dense<0.000000e+00> : vector<4x128xf32>
    %2 = tpu.matmul %0, %1, %cst {dimension_numbers = #tpu.dot_dimension_numbers<[1], [0], [0], [1], [0, 0, 1, 1], [], []>} : vector<4x128xf32>, vector<128x128xf32>, vector<4x128xf32> -> vector<4x128xf32>
    %c0_3 = arith.constant 0 : index
    %c0_4 = arith.constant 0 : index
    %3 = vector.load %arg3[%c0_3, %c0_4] : memref<1x128xf32, #tpu.memory_space<vmem>>, vector<1x128xf32>
    %4 = vector.broadcast %3 : vector<1x128xf32> to vector<4x128xf32>
    %5 = arith.addf %2, %4 : vector<4x128xf32>
    %cst_5 = arith.constant 0.000000e+00 : f32
    %6 = vector.broadcast %cst_5 : f32 to vector<4x128xf32>
    %7 = arith.maximumf %5, %6 : vector<4x128xf32>
    %c0_6 = arith.constant 0 : index
    %c0_7 = arith.constant 0 : index
    %8 = vector.load %arg4[%c0_6, %c0_7] : memref<128x128xf32, #tpu.memory_space<vmem>>, vector<128x128xf32>
    %cst_8 = arith.constant dense<0.000000e+00> : vector<4x128xf32>
    %9 = tpu.matmul %7, %8, %cst_8 {dimension_numbers = #tpu.dot_dimension_numbers<[1], [0], [0], [1], [0, 0, 1, 1], [], []>} : vector<4x128xf32>, vector<128x128xf32>, vector<4x128xf32> -> vector<4x128xf32>
    %c0_9 = arith.constant 0 : index
    %c0_10 = arith.constant 0 : index
    %10 = vector.load %arg5[%c0_9, %c0_10] : memref<1x128xf32, #tpu.memory_space<vmem>>, vector<1x128xf32>
    %11 = vector.broadcast %10 : vector<1x128xf32> to vector<4x128xf32>
    %12 = arith.addf %9, %11 : vector<4x128xf32>
    %cst_11 = arith.constant 0.000000e+00 : f32
    %13 = vector.broadcast %cst_11 : f32 to vector<4x128xf32>
    %14 = arith.maximumf %12, %13 : vector<4x128xf32>
    %c0_12 = arith.constant 0 : index
    %c0_13 = arith.constant 0 : index
    %15 = vector.load %arg6[%c0_12, %c0_13] : memref<128x32xf32, #tpu.memory_space<vmem>>, vector<128x32xf32>
    %cst_14 = arith.constant dense<0.000000e+00> : vector<4x32xf32>
    %16 = tpu.matmul %14, %15, %cst_14 {dimension_numbers = #tpu.dot_dimension_numbers<[1], [0], [0], [1], [0, 0, 1, 1], [], []>} : vector<4x128xf32>, vector<128x32xf32>, vector<4x32xf32> -> vector<4x32xf32>
    %c0_15 = arith.constant 0 : index
    %c0_16 = arith.constant 0 : index
    %17 = vector.load %arg7[%c0_15, %c0_16] : memref<1x32xf32, #tpu.memory_space<vmem>>, vector<1x32xf32>
    %18 = vector.broadcast %17 : vector<1x32xf32> to vector<4x32xf32>
    %19 = arith.addf %16, %18 : vector<4x32xf32>
    %c0_17 = arith.constant 0 : index
    %c0_18 = arith.constant 0 : index
    %20 = vector.load %arg8[%c0_17, %c0_18] : memref<4x32xf32, #tpu.memory_space<vmem>>, vector<4x32xf32>
    tpu.vector_store %arg8[%c0_17, %c0_18], %19 {strides = array<i32>} : memref<4x32xf32, #tpu.memory_space<vmem>>, vector<4x32xf32>,
    return
  }
  func.func @transform_0(%arg0: i32) -> (i32, i32) {
    %c0_i32 = arith.constant 0 : i32
    %c0_i32_0 = arith.constant 0 : i32
    return %arg0, %c0_i32 : i32, i32
  }
  func.func @transform_1(%arg0: i32) -> (i32, i32) {
    %c0_i32 = arith.constant 0 : i32
    %c0_i32_0 = arith.constant 0 : i32
    %c0_i32_1 = arith.constant 0 : i32
    return %c0_i32, %c0_i32_0 : i32, i32
  }
  func.func @transform_2(%arg0: i32) -> (i32, i32) {
    %c0_i32 = arith.constant 0 : i32
    %c0_i32_0 = arith.constant 0 : i32
    %c0_i32_1 = arith.constant 0 : i32
    return %c0_i32, %c0_i32_0 : i32, i32
  }
  func.func @transform_3(%arg0: i32) -> (i32, i32) {
    %c0_i32 = arith.constant 0 : i32
    %c0_i32_0 = arith.constant 0 : i32
    %c0_i32_1 = arith.constant 0 : i32
    return %c0_i32, %c0_i32_0 : i32, i32
  }
  func.func @transform_4(%arg0: i32) -> (i32, i32) {
    %c0_i32 = arith.constant 0 : i32
    %c0_i32_0 = arith.constant 0 : i32
    %c0_i32_1 = arith.constant 0 : i32
    return %c0_i32, %c0_i32_0 : i32, i32
  }
  func.func @transform_5(%arg0: i32) -> (i32, i32) {
    %c0_i32 = arith.constant 0 : i32
    %c0_i32_0 = arith.constant 0 : i32
    %c0_i32_1 = arith.constant 0 : i32
    return %c0_i32, %c0_i32_0 : i32, i32
  }
  func.func @transform_6(%arg0: i32) -> (i32, i32) {
    %c0_i32 = arith.constant 0 : i32
    %c0_i32_0 = arith.constant 0 : i32
    %c0_i32_1 = arith.constant 0 : i32
    return %c0_i32, %c0_i32_0 : i32, i32
  }
  func.func @transform_7(%arg0: i32) -> (i32, i32) {
    %c0_i32 = arith.constant 0 : i32
    %c0_i32_0 = arith.constant 0 : i32
    return %arg0, %c0_i32 : i32, i32
  }
}

</mosaic_0001>

<bundles_post_ra>
// kernel: tpu_custom_call.1
= control target key start
LH: loop header
LB: loop body
LE: loop exit
PB: predicated region body
PF: predicated region fallthrough
CT: control target
= control target key end

     0   :  { %12 = vsyncpa [#allocation3], 0  ;;  %s763_s0 = inlined_call_operand.vmem [shape: f32[4,128], index: 0, kind: input, shape index: {}]   ;;  %s764_s1 = inlined_call_operand.vmem [shape: f32[128,128], index: 1, kind: input, shape index: {}]   ;;  %s765_s2 = inlined_call_operand.vmem [shape: f32[1,128], index: 2, kind: input, shape index: {}]   ;;  %s766_s3 = inlined_call_operand.hbm [shape: f32[128,128], index: 3, kind: input, shape index: {}]   ;;  %s767_s4 = inlined_call_operand.vmem [shape: f32[1,128], index: 4, kind: input, shape index: {}]   ;;  %s768_s5 = inlined_call_operand.vmem [shape: f32[128,32], index: 5, kind: input, shape index: {}]   ;;  %s769_s6 = inlined_call_operand.vmem [shape: f32[1,32], index: 6, kind: input, shape index: {}]   ;;  %s770_s7 = inlined_call_operand.hbm [shape: f32[4,32], index: 7, kind: output, shape index: {}]  }
   0x1   :  { %13 = vsyncpa [#allocation4], 0  ;;  %s549_s24 = smov [#allocation2]  }
   0x2   :  { %s25_s25 = sshll.u32 %s549_s24, 4  ;;  %s26_s25 = int_to_ptr.vmem [resolvable:$true] %s25_s25 }
   0x3   :  { %s513_s26 = scalar_lea.vmem %s26_s25, 2048  ;;  %p518_p1 = scmp.lt.s32.totalorder %s26_s25, %s26_s25 }
   0x4   :  { %p514_p0 = scmp.ne.s32.totalorder %s26_s25, %s513_s26  ;;  %p519_p2 = scmp.lt.s32.totalorder %s513_s26, %s513_s26 }
   0x6   :  { %p520_p3 = por %p519_p2, %p518_p1 }
   0x8   :  { %p521_p4 = pnand %p520_p3, %p514_p0 }
   0xa   :  { %524 = shalt.err (!%p521_p4)
}
   0xb   :  { %s550_s27 = smov 128   ;;  %s551_s28 = smov 8  }
   0xc   :  { %31 = dma.hbm_to_vmem [thread:$0]  %s766_s3, 2048, %s26_s25, [#allocation3], %s550_s27, %s550_s27, %s551_s28  }
   0xd   :  { %545 = dma.done.wait [#allocation3], 2048  }
   0xe   :  { %546 = vsyncadd [#allocation3], 4294965248  ;;  %v552_v0 = vmov 0.0   ;;  %vm553_vm0 = vmmov 0   ;;  %v57_v1 = vld [vmem:[%s764_s1 + $0x78] sm:$0xff]  ;;  %v56_v2 = vld [vmem:[%s764_s1 + $0x70] sm:$0xff] }
   0xf   :  { %394 = vmatprep.subr.mxu0 %v552_v0  ;;  %426 = vmatprep.mubr.msk.f32.mxu0 %vm553_vm0, %v552_v0  ;;  %v55_v3 = vld [vmem:[%s764_s1 + $0x68] sm:$0xff]  ;;  %v54_v4 = vld [vmem:[%s764_s1 + $0x60] sm:$0xff]  ;;  %v151_v5 = vld [vmem:[#allocation2 + $0x78] sm:$0xff]  ;;  %s554_s26 = smov [#allocation5]   ;;  %vm323_vm1 = vcmask 257024  }
  0x10   :  { %429 = vmatprep.subr.mxu1 %v552_v0  ;;  %461 = vmatprep.mubr.msk.f32.mxu1 %vm553_vm0, %v552_v0  ;;  %v53_v6 = vld [vmem:[%s764_s1 + $0x58] sm:$0xff]  ;;  %v150_v7 = vld [vmem:[#allocation2 + $0x70] sm:$0xff]  ;;  %v149_v8 = vld [vmem:[#allocation2 + $0x68] sm:$0xff]  ;;  %s331_s27 = sshll.u32 %s554_s26, 4  ;;  %s332_s27 = int_to_ptr.vmem [resolvable:$true] %s331_s27 }
  0x11   :  { %395 = vmatpush3.msra.mxu0 %v57_v1  ;;  %430 = vmatpush3.msra.mxu1 %v151_v5  ;;  %v52_v9 = vld [vmem:[%s764_s1 + $0x50] sm:$0xff]  ;;  %v148_v10 = vld [vmem:[#allocation2 + $0x60] sm:$0xff]  ;;  %v51_v11 = vld [vmem:[%s764_s1 + $0x48] sm:$0xff]  ;;  %p530_p6 = scmp.lt.s32.totalorder %s332_s27, %s332_s27 }
  0x12   :  { %396 = vmatprep.subr.mxu0 %v552_v0  ;;  %431 = vmatprep.subr.mxu1 %v552_v0  ;;  %v147_v12 = vld [vmem:[#allocation2 + $0x58] sm:$0xff]  ;;  %v50_v13 = vld [vmem:[%s764_s1 + $0x40] sm:$0xff]  ;;  %v146_v14 = vld [vmem:[#allocation2 + $0x50] sm:$0xff] }
  0x13   :  { %397 = vmatpush3.msra.mxu0 %v56_v2  ;;  %432 = vmatpush3.msra.mxu1 %v150_v7  ;;  %v49_v15 = vld [vmem:[%s764_s1 + $0x38] sm:$0xff]  ;;  %v145_v16 = vld [vmem:[#allocation2 + $0x48] sm:$0xff]  ;;  %v48_v17 = vld [vmem:[%s764_s1 + $0x30] sm:$0xff] }
  0x14   :  { %398 = vmatprep.subr.mxu0 %v552_v0  ;;  %433 = vmatprep.subr.mxu1 %v552_v0  ;;  %v144_v18 = vld [vmem:[#allocation2 + $0x40] sm:$0xff]  ;;  %v47_v19 = vld [vmem:[%s764_s1 + $0x28] sm:$0xff]  ;;  %v143_v20 = vld [vmem:[#allocation2 + $0x38] sm:$0xff] }
  0x15   :  { %399 = vmatpush3.msra.mxu0 %v55_v3  ;;  %434 = vmatpush3.msra.mxu1 %v149_v8  ;;  %v46_v21 = vld [vmem:[%s764_s1 + $0x20] sm:$0xff]  ;;  %v142_v22 = vld [vmem:[#allocation2 + $0x30] sm:$0xff]  ;;  %v45_v23 = vld [vmem:[%s764_s1 + $0x18] sm:$0xff] }
  0x16   :  { %400 = vmatprep.subr.mxu0 %v552_v0  ;;  %435 = vmatprep.subr.mxu1 %v552_v0  ;;  %v141_v24 = vld [vmem:[#allocation2 + $0x28] sm:$0xff]  ;;  %v44_v25 = vld [vmem:[%s764_s1 + $0x10] sm:$0xff]  ;;  %v140_v26 = vld [vmem:[#allocation2 + $0x20] sm:$0xff] }
  0x17   :  { %401 = vmatpush3.msra.mxu0 %v54_v4  ;;  %436 = vmatpush3.msra.mxu1 %v148_v10  ;;  %v43_v27 = vld [vmem:[%s764_s1 + $0x8] sm:$0xff]  ;;  %v139_v28 = vld [vmem:[#allocation2 + $0x18] sm:$0xff]  ;;  %v42_v29 = vld [vmem:[%s764_s1] sm:$0xff] }
  0x18   :  { %402 = vmatprep.subr.mxu0 %v552_v0  ;;  %437 = vmatprep.subr.mxu1 %v552_v0  ;;  %v41_v30 = vld [vmem:[%s763_s0] sm:$0xf]  ;;  %v138_v31 = vld [vmem:[#allocation2 + $0x10] sm:$0xff]  ;;  %v137_v32 = vld [vmem:[#allocation2 + $0x8] sm:$0xff] }
  0x19   :  { %403 = vmatpush3.msra.mxu0 %v53_v6  ;;  %438 = vmatpush3.msra.mxu1 %v147_v12  ;;  %v136_v33 = vld [vmem:[#allocation2] sm:$0xff]  ;;  %v245_v34 = vld [vmem:[%s768_s5 + $0x78] sm:$0xff]  ;;  %v244_v35 = vld [vmem:[%s768_s5 + $0x70] sm:$0xff] }
  0x1a   :  { %404 = vmatprep.subr.mxu0 %v552_v0  ;;  %439 = vmatprep.subr.mxu1 %v552_v0  ;;  %v243_v36 = vld [vmem:[%s768_s5 + $0x68] sm:$0xff]  ;;  %v242_v37 = vld [vmem:[%s768_s5 + $0x60] sm:$0xff]  ;;  %v241_v38 = vld [vmem:[%s768_s5 + $0x58] sm:$0xff] }
  0x1b   :  { %405 = vmatpush3.msra.mxu0 %v52_v9  ;;  %440 = vmatpush3.msra.mxu1 %v146_v14  ;;  %v240_v39 = vld [vmem:[%s768_s5 + $0x50] sm:$0xff]  ;;  %v239_v40 = vld [vmem:[%s768_s5 + $0x48] sm:$0xff]  ;;  %v238_v41 = vld [vmem:[%s768_s5 + $0x40] sm:$0xff] }
  0x1c   :  { %406 = vmatprep.subr.mxu0 %v552_v0  ;;  %441 = vmatprep.subr.mxu1 %v552_v0  ;;  %v237_v42 = vld [vmem:[%s768_s5 + $0x38] sm:$0xff]  ;;  %v236_v43 = vld [vmem:[%s768_s5 + $0x30] sm:$0xff]  ;;  %v235_v44 = vld [vmem:[%s768_s5 + $0x28] sm:$0xff] }
  0x1d   :  { %407 = vmatpush3.msra.mxu0 %v51_v11  ;;  %442 = vmatpush3.msra.mxu1 %v145_v16  ;;  %v234_v45 = vld [vmem:[%s768_s5 + $0x20] sm:$0xff]  ;;  %v233_v46 = vld [vmem:[%s768_s5 + $0x18] sm:$0xff]  ;;  %v232_v52 = vld [vmem:[%s768_s5 + $0x10] sm:$0xff] }
  0x1e   :  { %408 = vmatprep.subr.mxu0 %v552_v0  ;;  %443 = vmatprep.subr.mxu1 %v552_v0  ;;  %v340_v47 = vld [vmem:[%s765_s2] ss:$0 sm:$0xff]  ;;  %v231_v53 = vld [vmem:[%s768_s5 + $0x8] sm:$0xff] }
  0x1f   :  { %409 = vmatpush3.msra.mxu0 %v50_v13  ;;  %444 = vmatpush3.msra.mxu1 %v144_v18  ;;  %v230_v54 = vld [vmem:[%s768_s5] sm:$0xff]  ;;  %s525_s5 = scalar_lea.vmem %s332_s27, 64 }
  0x20   :  { %410 = vmatprep.subr.mxu0 %v552_v0  ;;  %445 = vmatprep.subr.mxu1 %v552_v0  ;;  %v341_v55 = vld [vmem:[%s767_s4] ss:$0 sm:$0xff]  ;;  %p526_p5 = scmp.ne.s32.totalorder %s332_s27, %s525_s5  ;;  %p531_p7 = scmp.lt.s32.totalorder %s525_s5, %s525_s5 }
  0x21   :  { %411 = vmatpush3.msra.mxu0 %v49_v15  ;;  %446 = vmatpush3.msra.mxu1 %v143_v20  ;;  %v342_v60 = vld [vmem:[%s769_s6] ss:$0 sm:$0xff] }
  0x22   :  { %412 = vmatprep.subr.mxu0 %v552_v0  ;;  %447 = vmatprep.subr.mxu1 %v552_v0  ;;  %p532_p8 = por %p531_p7, %p530_p6 }
  0x23   :  { %413 = vmatpush3.msra.mxu0 %v48_v17  ;;  %448 = vmatpush3.msra.mxu1 %v142_v22 }
  0x24   :  { %414 = vmatprep.subr.mxu0 %v552_v0  ;;  %449 = vmatprep.subr.mxu1 %v552_v0  ;;  %p533_p9 = pnand %p532_p8, %p526_p5 }
  0x25   :  { %415 = vmatpush3.msra.mxu0 %v47_v19  ;;  %450 = vmatpush3.msra.mxu1 %v141_v24 }
  0x26   :  { %416 = vmatprep.subr.mxu0 %v552_v0  ;;  %451 = vmatprep.subr.mxu1 %v552_v0 }
  0x27   :  { %417 = vmatpush3.msra.mxu0 %v46_v21  ;;  %452 = vmatpush3.msra.mxu1 %v140_v26 }
  0x28   :  { %418 = vmatprep.subr.mxu0 %v552_v0  ;;  %453 = vmatprep.subr.mxu1 %v552_v0 }
  0x29   :  { %419 = vmatpush3.msra.mxu0 %v45_v23  ;;  %454 = vmatpush3.msra.mxu1 %v139_v28 }
  0x2a   :  { %420 = vmatprep.subr.mxu0 %v552_v0  ;;  %455 = vmatprep.subr.mxu1 %v552_v0 }
  0x2b   :  { %421 = vmatpush3.msra.mxu0 %v44_v25  ;;  %456 = vmatpush3.msra.mxu1 %v138_v31 }
  0x2c   :  { %422 = vmatprep.subr.mxu0 %v552_v0  ;;  %457 = vmatprep.subr.mxu1 %v552_v0 }
  0x2d   :  { %423 = vmatpush3.msra.mxu0 %v43_v27  ;;  %458 = vmatpush3.msra.mxu1 %v137_v32 }
  0x2e   :  { %424 = vmatprep.subr.mxu0 %v552_v0  ;;  %459 = vmatprep.subr.mxu1 %v552_v0 }
  0x2f   :  { %425 = vmatpush3.msra.mxu0 %v42_v29  ;;  %460 = vmatpush3.msra.mxu1 %v136_v33 }
  0x30   :  { %427 = vmatmul.mubr.f32.vlgmr.msra.gmra.mxu0 %v41_v30  ;;  %464 = vmatprep.subr.mxu0 %v552_v0 }
  0x31   :  { %496 = vmatprep.mubr.msk.f32.mxu0 %vm553_vm0, %v552_v0  ;;  %465 = vmatpush3.msra.mxu0 %v245_v34 }
  0x32   :  { %466 = vmatprep.subr.mxu0 %v552_v0 }
  0x33   :  { %467 = vmatpush3.msra.mxu0 %v244_v35 }
  0x34   :  { %468 = vmatprep.subr.mxu0 %v552_v0 }
  0x35   :  { %469 = vmatpush3.msra.mxu0 %v243_v36 }
  0x36   :  { %470 = vmatprep.subr.mxu0 %v552_v0 }
  0x37   :  { %471 = vmatpush3.msra.mxu0 %v242_v37 }
  0x38   :  { %472 = vmatprep.subr.mxu0 %v552_v0 }
  0x39   :  { %473 = vmatpush3.msra.mxu0 %v241_v38 }
  0x3a   :  { %474 = vmatprep.subr.mxu0 %v552_v0 }
  0x3b   :  { %475 = vmatpush3.msra.mxu0 %v240_v39 }
  0x3c   :  { %476 = vmatprep.subr.mxu0 %v552_v0 }
  0x3d   :  { %477 = vmatpush3.msra.mxu0 %v239_v40 }
  0x3e   :  { %478 = vmatprep.subr.mxu0 %v552_v0 }
  0x3f   :  { %479 = vmatpush3.msra.mxu0 %v238_v41 }
  0x40   :  { %480 = vmatprep.subr.mxu0 %v552_v0 }
  0x41   :  { %481 = vmatpush3.msra.mxu0 %v237_v42 }
  0x42   :  { %482 = vmatprep.subr.mxu0 %v552_v0 }
  0x43   :  { %483 = vmatpush3.msra.mxu0 %v236_v43 }
  0x44   :  { %484 = vmatprep.subr.mxu0 %v552_v0 }
  0x45   :  { %485 = vmatpush3.msra.mxu0 %v235_v44 }
  0x46   :  { %486 = vmatprep.subr.mxu0 %v552_v0 }
  0x47   :  { %487 = vmatpush3.msra.mxu0 %v234_v45 }
  0x48   :  { %488 = vmatprep.subr.mxu0 %v552_v0 }
  0x49   :  { %489 = vmatpush3.msra.mxu0 %v233_v46 }
  0x4a   :  { %490 = vmatprep.subr.mxu0 %v552_v0 }
  0x4b   :  { %491 = vmatpush3.msra.mxu0 %v232_v52 }
  0x4c   :  { %492 = vmatprep.subr.mxu0 %v552_v0 }
  0x4d   :  { %493 = vmatpush3.msra.mxu0 %v231_v53 }
  0x4e   :  { %494 = vmatprep.subr.mxu0 %v552_v0 }
  0x4f   :  { %495 = vmatpush3.msra.mxu0 %v230_v54 }
  0xf0   :  { %v131_v48 = vpop.f32.mrf.mxu0 }
  0xf1   :  { %v132_v49 = vadd.f32 %v340_v47, %v131_v48 }
  0xf2   :  { %v428_v50 = vpop.f32.mrf.mxu0 }
  0xf3   :  { %v135_v51 = vmax.f32 %v132_v49, 0.0 }
  0xf5   :  { %462 = vmatmul.mubr.f32.vlgmr.msra.gmra.mxu1 %v135_v51 }
 0x1b5   :  { %v225_v56 = vpop.f32.mrf.mxu1 }
 0x1b6   :  { %v226_v57 = vadd.f32 %v341_v55, %v225_v56 }
 0x1b7   :  { %v463_v58 = vpop.f32.mrf.mxu1 }
 0x1b8   :  { %v229_v59 = vmax.f32 %v226_v57, 0.0 }
 0x1ba   :  { %497 = vmatmul.mubr.f32.vlgmr.msra.gmra.mxu0 %v229_v59 }
 0x27a   :  { %v319_v61 = vpop.f32.mrf.mxu0 }
 0x27b   :  { %v320_v62 = vadd.f32 %v342_v60, %v319_v61 }
 0x27c   :  { %v498_v63 = vpop.f32.mrf.mxu0 }
 0x27d   :  { %324 = vst.msk [vmem:[#allocation5] sm:$0xf] %vm323_vm1, %v320_v62 }
 0x27e   :  { %536 = shalt.err (!%p533_p9)
}
 0x27f   :  { %334 = dma.vmem_to_hbm [thread:$0]  %s332_s27, 64, %s770_s7, [#allocation4]  }
 0x280   :  { %547 = dma.done.wait [#allocation4], 64  }
 0x281   :  { %548 = vsyncadd [#allocation4], 4294967232 }
 0x282   :  { %338 = vsyncpa [#allocation3], 1 }
 0x283   :  { %339 = vsyncpa [#allocation4], 1 }

</bundles_post_ra>
